<compile_context>
chip_gen: v5e
topology: v5e:2x2
jax: 0.10.0
libtpu: 0.0.40
codegen_flags: <defaults>
</compile_context>

<pallas_src>
import jax
import jax.numpy as jnp
from jax import lax
from jax.experimental import pallas as pl
from jax.experimental.pallas import tpu as pltpu


def _round_up(x, m):
    return ((x + m - 1) // m) * m


def _sublane(dtype):
    # Native sublane multiple per dtype packing (f32: 8, bf16: 16, int8/fp8: 32).
    return {4: 8, 2: 16, 1: 32}.get(jnp.dtype(dtype).itemsize, 8)


def _lora_linear_kernel(x_ref, w_ref, b_ref, a_ref, bsc_ref, o_ref,
                        acc_ref, mid_ref):
    # x_ref:   (TM, TK)   row tile of the flattened input
    # w_ref:   (TN, TK)   dense weight tile (native [out, in] layout)
    # b_ref:   (1,  TN)   bias tile (f32)
    # a_ref:   (R,  TK)   lora_A tile (native [r, in] layout)
    # bsc_ref: (TN, R)    scale * lora_B tile (native [out, r] layout)
    # o_ref:   (TM, TN)
    # acc_ref: (TM, TN)   f32 accumulator (resident across K)
    # mid_ref: (TM, R)    f32 accumulator for x @ A^T (resident across N and K)
    j = pl.program_id(1)
    k = pl.program_id(2)
    nk = pl.num_programs(2)

    @pl.when(k == 0)
    def _():
        acc_ref[...] = jnp.zeros_like(acc_ref)

    @pl.when(jnp.logical_and(j == 0, k == 0))
    def _():
        mid_ref[...] = jnp.zeros_like(mid_ref)

    x = x_ref[...]

    # Base dense path: contract x (TM, TK) with W tile (TN, TK) on K (MXU).
    acc_ref[...] += lax.dot_general(
        x, w_ref[...], (((1,), (1,)), ((), ())),
        preferred_element_type=jnp.float32)

    # LoRA rank-r projection depends only on the row tile: accumulate it over
    # K only during the first N-tile sweep and reuse it for all other N tiles.
    @pl.when(j == 0)
    def _():
        mid_ref[...] += lax.dot_general(
            x, a_ref[...], (((1,), (1,)), ((), ())),
            preferred_element_type=jnp.float32)

    # Finalize only on the last K step: bias + LoRA expansion + cast + store.
    @pl.when(k == nk - 1)
    def _():
        lora = lax.dot_general(
            mid_ref[...], bsc_ref[...], (((1,), (1,)), ((), ())),
            preferred_element_type=jnp.float32)
        o_ref[...] = (acc_ref[...] + b_ref[...] + lora).astype(o_ref.dtype)


def _linear_kernel(x_ref, w_ref, b_ref, o_ref, acc_ref):
    # Plain dense path (r == 0): y = x @ W^T + b
    k = pl.program_id(2)
    nk = pl.num_programs(2)

    @pl.when(k == 0)
    def _():
        acc_ref[...] = jnp.zeros_like(acc_ref)

    acc_ref[...] += lax.dot_general(
        x_ref[...], w_ref[...], (((1,), (1,)), ((), ())),
        preferred_element_type=jnp.float32)

    @pl.when(k == nk - 1)
    def _():
        o_ref[...] = (acc_ref[...] + b_ref[...]).astype(o_ref.dtype)


def perceiver_lora_linear(x, weight, bias, lora_A=None, lora_B=None, *,
                          r=8, alpha=16,
                          tile_m=256, tile_n=512, tile_k=512,
                          compute_dtype=None):
    """x: [..., in_features]; weight: [out, in]; bias: [out];
    lora_A: [r, in] or None; lora_B: [out, r] or None.

    compute_dtype: optionally cast x / weights to e.g. jnp.bfloat16 for higher
    MXU throughput on v6e / v7x (accumulation stays f32)."""
    in_features = x.shape[-1]
    out_features = weight.shape[0]
    lead_shape = x.shape[:-1]
    out_dtype = x.dtype

    use_lora = (r > 0) and (lora_A is not None) and (lora_B is not None)
    scale = alpha / r if r > 0 else 1.0

    x2d = x.reshape(-1, in_features)
    m = x2d.shape[0]

    if compute_dtype is not None:
        x2d = x2d.astype(compute_dtype)
        weight = weight.astype(compute_dtype)
        if use_lora:
            lora_A = lora_A.astype(compute_dtype)
            lora_B = lora_B.astype(compute_dtype)

    sub = _sublane(x2d.dtype)

    # Tile sizes: clamp to the (aligned) problem so tiny shapes don't over-pad.
    tm = min(tile_m, _round_up(m, sub))
    tn = min(tile_n, _round_up(out_features, 128))
    tk = min(tile_k, _round_up(in_features, 128))

    m_p = _round_up(m, tm)
    n_p = _round_up(out_features, tn)
    k_p = _round_up(in_features, tk)

    def pad2(a, rows, cols):
        pr, pc = rows - a.shape[0], cols - a.shape[1]
        if pr or pc:
            a = jnp.pad(a, ((0, pr), (0, pc)))
        return a

    x_p = pad2(x2d, m_p, k_p)
    w_p = pad2(weight, n_p, k_p)                     # keep native [out, in]
    b_p = bias.astype(jnp.float32)
    if n_p != out_features:
        b_p = jnp.pad(b_p, (0, n_p - out_features))
    b_p = b_p.reshape(1, n_p)

    grid = (m_p // tm, n_p // tn, k_p // tk)

    in_specs = [
        pl.BlockSpec((tm, tk), lambda i, j, k: (i, k)),   # x
        pl.BlockSpec((tn, tk), lambda i, j, k: (j, k)),   # W
        pl.BlockSpec((1, tn), lambda i, j, k: (0, j)),    # bias
    ]
    operands = [x_p, w_p, b_p]
    scratch = [pltpu.VMEM((tm, tn), jnp.float32)]         # acc

    bpe = jnp.dtype(x_p.dtype).itemsize
    vmem_bytes = (2 * tm * tk * bpe      # x (double-buffered)
                  + 2 * tn * tk * bpe    # W
                  + 2 * tn * 4           # bias
                  + 2 * tm * tn * bpe    # out
                  + tm * tn * 4)         # acc scratch

    if use_lora:
        a_p = pad2(lora_A, r, k_p)                             # [r, K_p]
        # Fold the LoRA scale into B once (tiny array, no per-tile VPU mul).
        bsc = (jnp.float32(scale) * lora_B.astype(jnp.float32)).astype(x_p.dtype)
        bsc_p = pad2(bsc, n_p, r)                              # [N_p, r]
        in_specs += [
            pl.BlockSpec((r, tk), lambda i, j, k: (0, k)),     # lora_A
            pl.BlockSpec((tn, r), lambda i, j, k: (j, 0)),     # scale*lora_B
        ]
        operands += [a_p, bsc_p]
        scratch += [pltpu.VMEM((tm, r), jnp.float32)]          # lora_mid
        vmem_bytes += 2 * r * tk * bpe + 2 * tn * r * bpe + tm * r * 4
        kernel = _lora_linear_kernel
    else:
        kernel = _linear_kernel

    # Explicit scoped-VMEM budget from the tile choice (+ headroom), kept well
    # under v7x's 64 MiB per-TensorCore ceiling.
    vmem_limit = min(max(int(vmem_bytes * 1.5) + (4 << 20), 16 << 20), 48 << 20)

    out_p = pl.pallas_call(
        kernel,
        out_shape=jax.ShapeDtypeStruct((m_p, n_p), out_dtype),
        grid_spec=pltpu.PrefetchScalarGridSpec(
            num_scalar_prefetch=0,
            grid=grid,
            in_specs=in_specs,
            out_specs=pl.BlockSpec((tm, tn), lambda i, j, k: (i, j)),
            scratch_shapes=scratch,
        ),
        compiler_params=pltpu.CompilerParams(
            # j and k carry accumulator state -> "arbitrary"; row tiles are
            # independent -> "parallel" (megacore sharding).
            dimension_semantics=("parallel", "arbitrary", "arbitrary"),
            vmem_limit_bytes=vmem_limit),
    )(*operands)

    out = out_p[:m, :out_features]
    return out.reshape(*lead_shape, out_features)


if __name__ == "__main__":
    key = jax.random.PRNGKey(0)

    # ---- Test 1: small shapes matching the module (single-tile grid). ----
    batch, seq = 2, 8
    in_features, out_features = 32, 64
    r, alpha = 8, 16

    k1, k2, k3, k4 = jax.random.split(key, 4)
    bound_w = 1.0 / (in_features ** 0.5)
    weight = jax.random.uniform(k2, (out_features, in_features), jnp.float32,
                                -bound_w, bound_w)
    bias = jnp.zeros((out_features,), jnp.float32)
    lora_A = jax.random.uniform(k3, (r, in_features), jnp.float32,
                                -bound_w, bound_w)
    # Module inits lora_B to zeros; use small nonzero values so the low-rank
    # path is actually exercised (shapes match the module exactly).
    lora_B = 0.01 * jax.random.normal(k4, (out_features, r), jnp.float32)
    x = jax.random.normal(k1, (batch, seq, in_features), jnp.float32)

    out = perceiver_lora_linear(x, weight, bias, lora_A, lora_B, r=r, alpha=alpha)
    out = jax.block_until_ready(out)
    scale = alpha / r
    ref = x @ weight.T + bias + scale * ((x @ lora_A.T) @ lora_B.T)
    assert out.shape == (batch, seq, out_features)
    assert jnp.allclose(out, ref, atol=1e-4, rtol=1e-4)

    # ---- Test 2: moderate shapes exercising a real 3-D grid (M, N, K tiles),
    # padding of M, accumulator init/finalize, and LoRA-mid reuse across N. ----
    b2, s2, in2, out2 = 2, 72, 256, 384
    k5, k6, k7, k8 = jax.random.split(jax.random.PRNGKey(1), 4)
    w2 = jax.random.normal(k6, (out2, in2), jnp.float32) * (1.0 / (in2 ** 0.5))
    bias2 = 0.1 * jax.random.normal(k8, (out2,), jnp.float32)
    a2 = jax.random.normal(k7, (r, in2), jnp.float32) * (1.0 / (in2 ** 0.5))
    bB2 = 0.01 * jax.random.normal(k8, (out2, r), jnp.float32)
    x2 = jax.random.normal(k5, (b2, s2, in2), jnp.float32)

    out2_arr = perceiver_lora_linear(x2, w2, bias2, a2, bB2, r=r, alpha=alpha,
                                     tile_m=64, tile_n=128, tile_k=128)
    out2_arr = jax.block_until_ready(out2_arr)
    ref2 = x2 @ w2.T + bias2 + scale * ((x2 @ a2.T) @ bB2.T)
    assert out2_arr.shape == (b2, s2, out2)
    assert jnp.allclose(out2_arr, ref2, atol=2e-2, rtol=2e-2)

    # ---- Test 3: r == 0 path (plain linear, LoRA guarded out entirely). ----
    out3 = perceiver_lora_linear(x, weight, bias, None, None, r=0, alpha=alpha)
    out3 = jax.block_until_ready(out3)
    ref3 = x @ weight.T + bias
    assert jnp.allclose(out3, ref3, atol=1e-4, rtol=1e-4)

    print("KERNEL_OK")
</pallas_src>

<mosaic_0001>
module attributes {stable_mosaic.version = 11 : i64} {
  func.func @_lora_linear_kernel(%arg0: i32, %arg1: i32, %arg2: i32, %arg3: memref<16x128xf32, #tpu.memory_space<vmem>>, %arg4: memref<128x128xf32, #tpu.memory_space<vmem>>, %arg5: memref<1x128xf32, #tpu.memory_space<vmem>>, %arg6: memref<8x128xf32, #tpu.memory_space<vmem>>, %arg7: memref<128x8xf32, #tpu.memory_space<vmem>>, %arg8: memref<16x128xf32, #tpu.memory_space<vmem>>, %arg9: memref<16x128xf32, #tpu.memory_space<vmem>>, %arg10: memref<16x8xf32, #tpu.memory_space<vmem>>) attributes {dimension_semantics = [#tpu.dimension_semantics<parallel>, #tpu.dimension_semantics<arbitrary>, #tpu.dimension_semantics<arbitrary>], iteration_bounds = array<i64: 1, 1, 1>, scalar_prefetch = 0 : i64, scratch_operands = 2 : i64, tpu.core_type = #tpu.core_type<tc>, window_params = [{transform_indices = @transform_0, window_bounds = array<i64: 16, 128>}, {transform_indices = @transform_1, window_bounds = array<i64: 128, 128>}, {transform_indices = @transform_2, window_bounds = array<i64: 1, 128>}, {transform_indices = @transform_3, window_bounds = array<i64: 8, 128>}, {transform_indices = @transform_4, window_bounds = array<i64: 128, 8>}, {transform_indices = @transform_5, window_bounds = array<i64: 16, 128>}]} {
    %c0_i32 = arith.constant 0 : i32
    %0 = arith.cmpi eq, %arg2, %c0_i32 : i32
    %1 = arith.extui %0 : i1 to i32
    %c0_i32_0 = arith.constant 0 : i32
    %2 = arith.cmpi ne, %1, %c0_i32_0 : i32
    scf.if %2 {
      %cst_15 = arith.constant 0.000000e+00 : f32
      %20 = vector.broadcast %cst_15 : f32 to vector<16x128xf32>
      %c0_16 = arith.constant 0 : index
      %c0_17 = arith.constant 0 : index
      %21 = vector.load %arg9[%c0_16, %c0_17] : memref<16x128xf32, #tpu.memory_space<vmem>>, vector<16x128xf32>
      tpu.vector_store %arg9[%c0_16, %c0_17], %20 {strides = array<i32>} : memref<16x128xf32, #tpu.memory_space<vmem>>, vector<16x128xf32>,
    } else {
    }
    %c0_i32_1 = arith.constant 0 : i32
    %3 = arith.cmpi eq, %arg1, %c0_i32_1 : i32
    %c0_i32_2 = arith.constant 0 : i32
    %4 = arith.cmpi eq, %arg2, %c0_i32_2 : i32
    %5 = arith.andi %3, %4 : i1
    %6 = arith.extui %5 : i1 to i32
    %c0_i32_3 = arith.constant 0 : i32
    %7 = arith.cmpi ne, %6, %c0_i32_3 : i32
    scf.if %7 {
      %cst_15 = arith.constant 0.000000e+00 : f32
      %20 = vector.broadcast %cst_15 : f32 to vector<16x8xf32>
      %c0_16 = arith.constant 0 : index
      %c0_17 = arith.constant 0 : index
      %21 = vector.load %arg10[%c0_16, %c0_17] : memref<16x8xf32, #tpu.memory_space<vmem>>, vector<16x8xf32>
      tpu.vector_store %arg10[%c0_16, %c0_17], %20 {strides = array<i32>} : memref<16x8xf32, #tpu.memory_space<vmem>>, vector<16x8xf32>,
    } else {
    }
    %c0 = arith.constant 0 : index
    %c0_4 = arith.constant 0 : index
    %8 = vector.load %arg3[%c0, %c0_4] : memref<16x128xf32, #tpu.memory_space<vmem>>, vector<16x128xf32>
    %c0_5 = arith.constant 0 : index
    %c0_6 = arith.constant 0 : index
    %9 = vector.load %arg9[%c0_5, %c0_6] : memref<16x128xf32, #tpu.memory_space<vmem>>, vector<16x128xf32>
    %c0_7 = arith.constant 0 : index
    %c0_8 = arith.constant 0 : index
    %10 = vector.load %arg4[%c0_7, %c0_8] : memref<128x128xf32, #tpu.memory_space<vmem>>, vector<128x128xf32>
    %cst = arith.constant dense<0.000000e+00> : vector<16x128xf32>
    %11 = tpu.matmul %8, %10, %cst {dimension_numbers = #tpu.dot_dimension_numbers<[1], [1], [0], [0], [0, 0, 1, 0], [], []>} : vector<16x128xf32>, vector<128x128xf32>, vector<16x128xf32> -> vector<16x128xf32>
    %12 = arith.addf %9, %11 : vector<16x128xf32>
    %c0_9 = arith.constant 0 : index
    %c0_10 = arith.constant 0 : index
    %13 = vector.load %arg9[%c0_9, %c0_10] : memref<16x128xf32, #tpu.memory_space<vmem>>, vector<16x128xf32>
    tpu.vector_store %arg9[%c0_9, %c0_10], %12 {strides = array<i32>} : memref<16x128xf32, #tpu.memory_space<vmem>>, vector<16x128xf32>,
    %c0_i32_11 = arith.constant 0 : i32
    %14 = arith.cmpi eq, %arg1, %c0_i32_11 : i32
    %15 = arith.extui %14 : i1 to i32
    %c0_i32_12 = arith.constant 0 : i32
    %16 = arith.cmpi ne, %15, %c0_i32_12 : i32
    scf.if %16 {
      %c0_15 = arith.constant 0 : index
      %c0_16 = arith.constant 0 : index
      %20 = vector.load %arg10[%c0_15, %c0_16] : memref<16x8xf32, #tpu.memory_space<vmem>>, vector<16x8xf32>
      %c0_17 = arith.constant 0 : index
      %c0_18 = arith.constant 0 : index
      %21 = vector.load %arg6[%c0_17, %c0_18] : memref<8x128xf32, #tpu.memory_space<vmem>>, vector<8x128xf32>
      %cst_19 = arith.constant dense<0.000000e+00> : vector<16x8xf32>
      %22 = tpu.matmul %8, %21, %cst_19 {dimension_numbers = #tpu.dot_dimension_numbers<[1], [1], [0], [0], [0, 0, 1, 0], [], []>} : vector<16x128xf32>, vector<8x128xf32>, vector<16x8xf32> -> vector<16x8xf32>
      %23 = arith.addf %20, %22 : vector<16x8xf32>
      %c0_20 = arith.constant 0 : index
      %c0_21 = arith.constant 0 : index
      %24 = vector.load %arg10[%c0_20, %c0_21] : memref<16x8xf32, #tpu.memory_space<vmem>>, vector<16x8xf32>
      tpu.vector_store %arg10[%c0_20, %c0_21], %23 {strides = array<i32>} : memref<16x8xf32, #tpu.memory_space<vmem>>, vector<16x8xf32>,
    } else {
    }
    %c0_i32_13 = arith.constant 0 : i32
    %17 = arith.cmpi eq, %arg2, %c0_i32_13 : i32
    %18 = arith.extui %17 : i1 to i32
    %c0_i32_14 = arith.constant 0 : i32
    %19 = arith.cmpi ne, %18, %c0_i32_14 : i32
    scf.if %19 {
      %c0_15 = arith.constant 0 : index
      %c0_16 = arith.constant 0 : index
      %20 = vector.load %arg10[%c0_15, %c0_16] : memref<16x8xf32, #tpu.memory_space<vmem>>, vector<16x8xf32>
      %c0_17 = arith.constant 0 : index
      %c0_18 = arith.constant 0 : index
      %21 = vector.load %arg7[%c0_17, %c0_18] : memref<128x8xf32, #tpu.memory_space<vmem>>, vector<128x8xf32>
      %cst_19 = arith.constant dense<0.000000e+00> : vector<16x128xf32>
      %22 = tpu.matmul %20, %21, %cst_19 {dimension_numbers = #tpu.dot_dimension_numbers<[1], [1], [0], [0], [0, 0, 1, 0], [], []>} : vector<16x8xf32>, vector<128x8xf32>, vector<16x128xf32> -> vector<16x128xf32>
      %c0_20 = arith.constant 0 : index
      %c0_21 = arith.constant 0 : index
      %23 = vector.load %arg9[%c0_20, %c0_21] : memref<16x128xf32, #tpu.memory_space<vmem>>, vector<16x128xf32>
      %c0_22 = arith.constant 0 : index
      %c0_23 = arith.constant 0 : index
      %24 = vector.load %arg5[%c0_22, %c0_23] : memref<1x128xf32, #tpu.memory_space<vmem>>, vector<1x128xf32>
      %25 = vector.broadcast %24 : vector<1x128xf32> to vector<16x128xf32>
      %26 = arith.addf %23, %25 : vector<16x128xf32>
      %27 = arith.addf %26, %22 : vector<16x128xf32>
      %c0_24 = arith.constant 0 : index
      %c0_25 = arith.constant 0 : index
      %28 = vector.load %arg8[%c0_24, %c0_25] : memref<16x128xf32, #tpu.memory_space<vmem>>, vector<16x128xf32>
      tpu.vector_store %arg8[%c0_24, %c0_25], %27 {strides = array<i32>} : memref<16x128xf32, #tpu.memory_space<vmem>>, vector<16x128xf32>,
    } else {
    }
    return
  }
  func.func @transform_0(%arg0: i32, %arg1: i32, %arg2: i32) -> (i32, i32) {
    %c0_i32 = arith.constant 0 : i32
    return %arg0, %arg2 : i32, i32
  }
  func.func @transform_1(%arg0: i32, %arg1: i32, %arg2: i32) -> (i32, i32) {
    %c0_i32 = arith.constant 0 : i32
    return %arg1, %arg2 : i32, i32
  }
  func.func @transform_2(%arg0: i32, %arg1: i32, %arg2: i32) -> (i32, i32) {
    %c0_i32 = arith.constant 0 : i32
    %c0_i32_0 = arith.constant 0 : i32
    return %c0_i32, %arg1 : i32, i32
  }
  func.func @transform_3(%arg0: i32, %arg1: i32, %arg2: i32) -> (i32, i32) {
    %c0_i32 = arith.constant 0 : i32
    %c0_i32_0 = arith.constant 0 : i32
    return %c0_i32, %arg2 : i32, i32
  }
  func.func @transform_4(%arg0: i32, %arg1: i32, %arg2: i32) -> (i32, i32) {
    %c0_i32 = arith.constant 0 : i32
    %c0_i32_0 = arith.constant 0 : i32
    return %arg1, %c0_i32 : i32, i32
  }
  func.func @transform_5(%arg0: i32, %arg1: i32, %arg2: i32) -> (i32, i32) {
    %c0_i32 = arith.constant 0 : i32
    return %arg0, %arg1 : i32, i32
  }
}

</mosaic_0001>

<bundles_post_ra>
// kernel: tpu_custom_call.1
= control target key start
LH: loop header
LB: loop body
LE: loop exit
PB: predicated region body
PF: predicated region fallthrough
CT: control target
= control target key end

     0   :  { %10 = vsyncpa [#allocation5], 0  ;;  %s565_s0 = inlined_call_operand.hbm [shape: f32[16,128], index: 0, kind: input, shape index: {}]   ;;  %s566_s1 = inlined_call_operand.vmem [shape: f32[128,128], index: 1, kind: input, shape index: {}]   ;;  %s567_s2 = inlined_call_operand.vmem [shape: f32[1,128], index: 2, kind: input, shape index: {}]   ;;  %s568_s3 = inlined_call_operand.vmem [shape: f32[8,128], index: 3, kind: input, shape index: {}]   ;;  %s569_s4 = inlined_call_operand.vmem [shape: f32[128,8], index: 4, kind: input, shape index: {}]   ;;  %s570_s5 = inlined_call_operand.hbm [shape: f32[16,128], index: 5, kind: output, shape index: {}]  }
   0x1   :  { %11 = vsyncpa [#allocation6], 0  ;;  %s16_s20 = sshll.u32 %s565_s0, 4  ;;  %s370_s21 = smov [#allocation4]   ;;  %s17_s20 = int_to_ptr.hbm [resolvable:$true] %s16_s20 }
   0x2   :  { %s18_s22 = sshll.u32 %s370_s21, 4  ;;  %s371_s23 = smov 128   ;;  %s19_s22 = int_to_ptr.vmem [resolvable:$true] %s18_s22 }
   0x3   :  { %s372_s24 = smov 8  }
   0x4   :  { %24 = dma.hbm_to_vmem [thread:$0]  %s17_s20, 256, %s19_s22, [#allocation5], %s371_s23, %s371_s23, %s372_s24  }
   0x5   :  { %366 = dma.done.wait [#allocation5], 256  }
   0x6   :  { %367 = vsyncadd [#allocation5], 4294967040  ;;  %vm48_vm0 = vcmask 64512   ;;  %v103_v0 = vld [vmem:[%s568_s3] sm:$0xff]  ;;  %v414_v1 = vld [vmem:[#allocation4] sm:$0xff]  ;;  %v373_v17 = vmov 0.0  }
   0x7   :  { %119 = vmatpush.xpose.msra.mxu1 %v103_v0  ;;  %v70_v2 = vld [vmem:[%s566_s1 + $0x78] sm:$0xff]  ;;  %v69_v4 = vld [vmem:[%s566_s1 + $0x70] sm:$0xff]  ;;  %v68_v6 = vld [vmem:[%s566_s1 + $0x68] sm:$0xff]  ;;  %49 = vst.msk [vmem:[#allocation3] sm:$0xff] %vm48_vm0, %v373_v17  ;;  %s374_s14 = smov [#allocation7]   ;;  %s249_s18 = sshll.u32 %s570_s5, 4  ;;  %s250_s18 = int_to_ptr.hbm [resolvable:$true] %s249_s18 }
   0x8   :  { %v152_v3 = vld [vmem:[%s569_s4 + $0x78] sm:$0xff]  ;;  %71 = vmatpush.xpose.msra.mxu0 %v70_v2  ;;  %v151_v5 = vld [vmem:[%s569_s4 + $0x70] sm:$0xff]  ;;  %280 = vmatpush.xpose.msra.mxu3 %v70_v2  ;;  %v150_v7 = vld [vmem:[%s569_s4 + $0x68] sm:$0xff]  ;;  %50 = vst.msk [vmem:[#allocation3 + $0x8] sm:$0xff] %vm48_vm0, %v373_v17  ;;  %s247_s15 = sshll.u32 %s374_s14, 4  ;;  %s248_s15 = int_to_ptr.vmem [resolvable:$true] %s247_s15 }
   0x9   :  { %296 = vmatpush.xpose.msk.msra.mxu2 %vm48_vm0, %v152_v3  ;;  %v439_v8 = vld [vmem:[#allocation4 + $0x8] sm:$0xff]  ;;  %v67_v9 = vld [vmem:[%s566_s1 + $0x60] sm:$0xff]  ;;  %v65_v13 = vld [vmem:[%s566_s1 + $0x50] sm:$0xff] }
   0xa   :  { %120 = vmatmul.f32.vlgmr.msra.gmra.mxu1 %v414_v1  ;;  %v149_v10 = vld [vmem:[%s569_s4 + $0x60] sm:$0xff]  ;;  %v66_v11 = vld [vmem:[%s566_s1 + $0x58] sm:$0xff]  ;;  %v147_v14 = vld [vmem:[%s569_s4 + $0x50] sm:$0xff] }
   0xb   :  { %262 = vmatpush.xpose.msk.msrb.mxu1 %vm48_vm0, %v152_v3  ;;  %v148_v12 = vld [vmem:[%s569_s4 + $0x58] sm:$0xff]  ;;  %v64_v15 = vld [vmem:[%s566_s1 + $0x48] sm:$0xff]  ;;  %v63_v18 = vld [vmem:[%s566_s1 + $0x40] sm:$0xff] }
   0xc   :  { %72 = vmatpush.xpose.msra.mxu0 %v69_v4  ;;  %281 = vmatpush.xpose.msra.mxu3 %v69_v4  ;;  %v146_v16 = vld [vmem:[%s569_s4 + $0x48] sm:$0xff]  ;;  %v145_v19 = vld [vmem:[%s569_s4 + $0x40] sm:$0xff]  ;;  %v62_v20 = vld [vmem:[%s566_s1 + $0x38] sm:$0xff] }
   0xd   :  { %297 = vmatpush.xpose.msk.msra.mxu2 %vm48_vm0, %v151_v5  ;;  %v144_v21 = vld [vmem:[%s569_s4 + $0x38] sm:$0xff]  ;;  %v61_v22 = vld [vmem:[%s566_s1 + $0x30] sm:$0xff]  ;;  %v60_v24 = vld [vmem:[%s566_s1 + $0x28] sm:$0xff] }
   0xe   :  { %v143_v23 = vld [vmem:[%s569_s4 + $0x30] sm:$0xff]  ;;  %v142_v25 = vld [vmem:[%s569_s4 + $0x28] sm:$0xff]  ;;  %v59_v26 = vld [vmem:[%s566_s1 + $0x20] sm:$0xff] }
   0xf   :  { %263 = vmatpush.xpose.msk.msrb.mxu1 %vm48_vm0, %v151_v5  ;;  %v141_v27 = vld [vmem:[%s569_s4 + $0x20] sm:$0xff]  ;;  %v58_v28 = vld [vmem:[%s566_s1 + $0x18] sm:$0xff]  ;;  %v57_v30 = vld [vmem:[%s566_s1 + $0x10] sm:$0xff] }
  0x10   :  { %73 = vmatpush.xpose.msra.mxu0 %v68_v6  ;;  %282 = vmatpush.xpose.msra.mxu3 %v68_v6  ;;  %v140_v29 = vld [vmem:[%s569_s4 + $0x18] sm:$0xff]  ;;  %v139_v31 = vld [vmem:[%s569_s4 + $0x10] sm:$0xff]  ;;  %v56_v32 = vld [vmem:[%s566_s1 + $0x8] sm:$0xff] }
  0x11   :  { %298 = vmatpush.xpose.msk.msra.mxu2 %vm48_vm0, %v150_v7  ;;  %v138_v33 = vld [vmem:[%s569_s4 + $0x8] sm:$0xff]  ;;  %v55_v34 = vld [vmem:[%s566_s1] sm:$0xff] }
  0x12   :  { %123 = vmatmul.f32.gmra.mxu1 %v439_v8  ;;  %v137_v35 = vld [vmem:[%s569_s4] sm:$0xff]  ;;  %v102_v39 = vld [vmem:[#allocation3 + $0x8] sm:$0xff] }
  0x13   :  { %264 = vmatpush.xpose.msk.msrb.mxu1 %vm48_vm0, %v150_v7  ;;  %v101_v36 = vld [vmem:[#allocation3] sm:$0xff] }
  0x14   :  { %74 = vmatpush.xpose.msra.mxu0 %v67_v9  ;;  %283 = vmatpush.xpose.msra.mxu3 %v67_v9  ;;  %v317_v44 = vld [vmem:[%s567_s2] ss:$0 sm:$0xff] }
  0x15   :  { %299 = vmatpush.xpose.msk.msra.mxu2 %vm48_vm0, %v149_v10 }
  0x17   :  { %265 = vmatpush.xpose.msk.msrb.mxu1 %vm48_vm0, %v149_v10 }
  0x18   :  { %75 = vmatpush.xpose.msra.mxu0 %v66_v11  ;;  %284 = vmatpush.xpose.msra.mxu3 %v66_v11 }
  0x19   :  { %300 = vmatpush.xpose.msk.msra.mxu2 %vm48_vm0, %v148_v12 }
  0x1b   :  { %266 = vmatpush.xpose.msk.msrb.mxu1 %vm48_vm0, %v148_v12 }
  0x1c   :  { %76 = vmatpush.xpose.msra.mxu0 %v65_v13  ;;  %285 = vmatpush.xpose.msra.mxu3 %v65_v13 }
  0x1d   :  { %301 = vmatpush.xpose.msk.msra.mxu2 %vm48_vm0, %v147_v14 }
  0x1f   :  { %267 = vmatpush.xpose.msk.msrb.mxu1 %vm48_vm0, %v147_v14 }
  0x20   :  { %77 = vmatpush.xpose.msra.mxu0 %v64_v15  ;;  %286 = vmatpush.xpose.msra.mxu3 %v64_v15 }
  0x21   :  { %302 = vmatpush.xpose.msk.msra.mxu2 %vm48_vm0, %v146_v16 }
  0x23   :  { %268 = vmatpush.xpose.msk.msrb.mxu1 %vm48_vm0, %v146_v16 }
  0x24   :  { %78 = vmatpush.xpose.msra.mxu0 %v63_v18  ;;  %287 = vmatpush.xpose.msra.mxu3 %v63_v18 }
  0x25   :  { %303 = vmatpush.xpose.msk.msra.mxu2 %vm48_vm0, %v145_v19 }
  0x27   :  { %269 = vmatpush.xpose.msk.msrb.mxu1 %vm48_vm0, %v145_v19 }
  0x28   :  { %79 = vmatpush.xpose.msra.mxu0 %v62_v20  ;;  %288 = vmatpush.xpose.msra.mxu3 %v62_v20 }
  0x29   :  { %304 = vmatpush.xpose.msk.msra.mxu2 %vm48_vm0, %v144_v21 }
  0x2b   :  { %270 = vmatpush.xpose.msk.msrb.mxu1 %vm48_vm0, %v144_v21 }
  0x2c   :  { %80 = vmatpush.xpose.msra.mxu0 %v61_v22  ;;  %289 = vmatpush.xpose.msra.mxu3 %v61_v22 }
  0x2d   :  { %305 = vmatpush.xpose.msk.msra.mxu2 %vm48_vm0, %v143_v23 }
  0x2f   :  { %271 = vmatpush.xpose.msk.msrb.mxu1 %vm48_vm0, %v143_v23 }
  0x30   :  { %81 = vmatpush.xpose.msra.mxu0 %v60_v24  ;;  %290 = vmatpush.xpose.msra.mxu3 %v60_v24 }
  0x31   :  { %306 = vmatpush.xpose.msk.msra.mxu2 %vm48_vm0, %v142_v25 }
  0x33   :  { %272 = vmatpush.xpose.msk.msrb.mxu1 %vm48_vm0, %v142_v25 }
  0x34   :  { %82 = vmatpush.xpose.msra.mxu0 %v59_v26  ;;  %291 = vmatpush.xpose.msra.mxu3 %v59_v26 }
  0x35   :  { %307 = vmatpush.xpose.msk.msra.mxu2 %vm48_vm0, %v141_v27 }
  0x37   :  { %273 = vmatpush.xpose.msk.msrb.mxu1 %vm48_vm0, %v141_v27 }
  0x38   :  { %83 = vmatpush.xpose.msra.mxu0 %v58_v28  ;;  %292 = vmatpush.xpose.msra.mxu3 %v58_v28 }
  0x39   :  { %308 = vmatpush.xpose.msk.msra.mxu2 %vm48_vm0, %v140_v29 }
  0x3b   :  { %274 = vmatpush.xpose.msk.msrb.mxu1 %vm48_vm0, %v140_v29 }
  0x3c   :  { %84 = vmatpush.xpose.msra.mxu0 %v57_v30  ;;  %293 = vmatpush.xpose.msra.mxu3 %v57_v30 }
  0x3d   :  { %309 = vmatpush.xpose.msk.msra.mxu2 %vm48_vm0, %v139_v31 }
  0x3f   :  { %275 = vmatpush.xpose.msk.msrb.mxu1 %vm48_vm0, %v139_v31 }
  0x40   :  { %85 = vmatpush.xpose.msra.mxu0 %v56_v32  ;;  %294 = vmatpush.xpose.msra.mxu3 %v56_v32 }
  0x41   :  { %310 = vmatpush.xpose.msk.msra.mxu2 %vm48_vm0, %v138_v33 }
  0x43   :  { %276 = vmatpush.xpose.msk.msrb.mxu1 %vm48_vm0, %v138_v33 }
  0x44   :  { %86 = vmatpush.xpose.msra.mxu0 %v55_v34  ;;  %295 = vmatpush.xpose.msra.mxu3 %v55_v34 }
  0x45   :  { %311 = vmatpush.xpose.msk.msra.mxu2 %vm48_vm0, %v137_v35 }
  0x47   :  { %277 = vmatpush.xpose.msk.msrb.mxu1 %vm48_vm0, %v137_v35  ;;  %87 = vmatmul.f32.vlgmr.msra.gmra.mxu0 %v414_v1 }
  0x48   :  { %90 = vmatmul.f32.vlgmr.msra.gmra.mxu3 %v439_v8 }
  0x87   :  { %v121_v37 = vpop.f32.mrf.mxu1 }
  0x88   :  { %v127_v38 = vadd.f32 %v121_v37, %v101_v36 }
  0x8a   :  { %130 = vst.msk [vmem:[#allocation3] sm:$0xff] %vm48_vm0, %v127_v38 }
  0x8f   :  { %v124_v40 = vpop.f32.mrf.mxu1 }
  0x90   :  { %v128_v41 = vadd.f32 %v124_v40, %v102_v39 }
  0x91   :  { %v135_v42 = vld [vmem:[#allocation3] sm:$0xff] }
  0x92   :  { %131 = vst.msk [vmem:[#allocation3 + $0x8] sm:$0xff] %vm48_vm0, %v128_v41  ;;  %278 = vmatmul.msk.f32.vlgmr.msrb.gmra.mxu1 %vm48_vm0, %v135_v42 }
  0x99   :  { %v136_v43 = vld [vmem:[#allocation3 + $0x8] sm:$0xff] }
  0x9a   :  { %279 = vmatmul.msk.f32.vlgmr.msra.gmra.mxu2 %vm48_vm0, %v136_v43 }
  0xc4   :  { %v88_v45 = vpop.f32.mrf.mxu0 }
  0xc5   :  { %v237_v46 = vadd.f32 %v317_v44, %v88_v45 }
  0xcb   :  { %v91_v49 = vpop.f32.mrf.mxu3 }
  0xcc   :  { %v238_v50 = vadd.f32 %v317_v44, %v91_v49 }
 0x10f   :  { %v225_v47 = vpop.f32.mrf.mxu1 }
 0x110   :  { %v239_v48 = vadd.f32 %v237_v46, %v225_v47 }
 0x112   :  { %241 = vst [vmem:[#allocation7] sm:$0xff] %v239_v48 }
 0x11d   :  { %v228_v51 = vpop.f32.mrf.mxu2 }
 0x11e   :  { %v240_v52 = vadd.f32 %v238_v50, %v228_v51 }
 0x120   :  { %242 = vst [vmem:[#allocation7 + $0x8] sm:$0xff] %v240_v52 }
 0x121   :  { %255 = dma.vmem_to_hbm [thread:$0]  %s248_s15, 256, %s250_s18, [#allocation6], %s371_s23, %s371_s23, %s372_s24  }
 0x122   :  { %368 = dma.done.wait [#allocation6], 256  }
 0x123   :  { %369 = vsyncadd [#allocation6], 4294967040 }
 0x124   :  { %260 = vsyncpa [#allocation5], 1 }
 0x125   :  { %261 = vsyncpa [#allocation6], 1 }

</bundles_post_ra>
